<compile_context>
chip_gen: v6e
topology: v6e:2x2x1
jax: 0.10.0
libtpu: 0.0.40
codegen_flags: <defaults>
</compile_context>

<pallas_src>
import functools
from math import exp

import jax
import jax.numpy as jnp
from jax import lax
from jax.experimental import pallas as pl
from jax.experimental.pallas import tpu as pltpu

C1 = 0.01 ** 2
C2 = 0.03 ** 2


def _cdiv(a, b):
    return -(-a // b)


def _round_up(a, b):
    return _cdiv(a, b) * b


def gaussian_1d(window_size, sigma):
    g = jnp.array(
        [exp(-(x - window_size // 2) ** 2 / float(2 * sigma ** 2))
         for x in range(window_size)],
        dtype=jnp.float32)
    return g / jnp.sum(g)


def band_matrix(n, g, pad):
    # Banded matrix A with A[i, j] = g[j - i + pad] (zero padding at edges).
    # (A @ z) reproduces F.conv2d's zero-padded cross-correlation along one
    # spatial axis; the Gaussian is symmetric so corr == conv anyway.
    ws = g.shape[0]
    i = jnp.arange(n)[:, None]
    j = jnp.arange(n)[None, :]
    k = j - i + pad
    valid = (k >= 0) & (k < ws)
    return jnp.where(valid, g[jnp.clip(k, 0, ws - 1)], 0.0).astype(jnp.float32)


def _mse_ssim_kernel(pred_ref, tgt_ref, m_ref, out_ref, *, n_planes, k_planes):
    x = pred_ref[...].astype(jnp.float32)       # (K, P)  K lane-dense planes
    y = tgt_ref[...].astype(jnp.float32)        # (K, P)
    m = m_ref[...]                              # (P, P)  2-D conv matrix (bf16)

    d = x - y                                   # padded planes: 0 - 0 = 0

    # Stack the five conv operands along sublanes -> one MXU matmul with a
    # full P-deep contraction (bf16 operands, f32 accumulate).
    # NOTE: bf16 x*x / y*y operands can perturb SSIM on near-constant patches
    # (sigma -> 0); pass matmul_dtype=jnp.float32 in the wrapper if needed.
    z5 = jnp.concatenate([x, y, x * x, y * y, x * y], axis=0)       # (5K, P)
    c = jnp.dot(z5.astype(m.dtype), m,
                preferred_element_type=jnp.float32)                 # (5K, P)

    k = k_planes
    mu1 = c[0 * k:1 * k]
    mu2 = c[1 * k:2 * k]
    e_xx = c[2 * k:3 * k]
    e_yy = c[3 * k:4 * k]
    e_xy = c[4 * k:5 * k]

    mu1_sq = mu1 * mu1
    mu2_sq = mu2 * mu2
    mu1_mu2 = mu1 * mu2
    sigma1_sq = e_xx - mu1_sq
    sigma2_sq = e_yy - mu2_sq
    sigma12 = e_xy - mu1_mu2

    num = (2.0 * mu1_mu2 + C1) * (2.0 * sigma12 + C2)
    den = (mu1_sq + mu2_sq + C1) * (sigma1_sq + sigma2_sq + C2)
    # EUP approx reciprocal + one Newton refinement ~= f32-accurate divide.
    r = pl.reciprocal(den, approx=True)
    r = r * (2.0 - den * r)
    ssim_map = num * r                          # (K, P)

    if n_planes % k_planes != 0:
        # Only the last step carries zero-padded planes; they would otherwise
        # contribute ssim == 1, so mask them (MSE is already 0 there).
        row = lax.broadcasted_iota(jnp.int32, ssim_map.shape, 0)
        valid_rows = n_planes - pl.program_id(0) * k_planes
        ssim_map = jnp.where(row < valid_rows, ssim_map, 0.0)

    # Lane-dense, sublane-reduced partial sums, written as two direct row
    # stores (no concat copy).  Wrapper finishes the scalar reduction, so the
    # grid axis stays free of carried state ("parallel").
    out_ref[0, 0:1, :] = jnp.sum(d * d, axis=0, keepdims=True)
    out_ref[0, 1:2, :] = jnp.sum(ssim_map, axis=0, keepdims=True)


def mse_and_ssim_loss(pred, target, loss_weight=100.0, window_size=11,
                      sigma=1.5, max_planes_per_step=128,
                      matmul_dtype=jnp.bfloat16):
    # TODO(synk): the optional weight= / reduction='sum' / sample_wise paths of
    # mask_reduce_loss are not implemented; this matches the default forward
    # (weight=None, reduction='mean', size_average=True).
    assert pred.shape == target.shape and pred.ndim == 4
    B, C, H, W = pred.shape
    N = B * C
    P = H * W
    pad = window_size // 2
    g = gaussian_1d(window_size, sigma)

    # Full 2-D zero-padded Gaussian conv of a flattened plane (row vector):
    #   conv(z)_flat = z_flat @ (A_h^T kron A_w^T)
    A_h = band_matrix(H, g, pad)                       # (H, H)
    A_w = band_matrix(W, g, pad)                       # (W, W)
    M = jnp.kron(A_h.T, A_w.T).astype(matmul_dtype)    # (P, P)

    # Planes per grid step: a multiple of 8 (sublane tile) so the in-kernel
    # operand stack and slices stay (8, 128)-aligned.
    K = min(_round_up(max_planes_per_step, 8), _round_up(N, 8))
    steps = _cdiv(N, K)
    if steps > 1 and steps % 2 == 1:
        # v7x megacore: prefer an even step count so both TensorCores get work.
        k_alt = _round_up(_cdiv(N, steps + 1), 8)
        if k_alt >= 8 and _cdiv(N, k_alt) % 2 == 0:
            K = k_alt
            steps = _cdiv(N, K)

    # Free reshape of contiguous NCHW; pad only the plane axis when needed.
    p = pred.reshape(N, P)
    t = target.reshape(N, P)
    if steps * K != N:
        p = jnp.pad(p, ((0, steps * K - N), (0, 0)))
        t = jnp.pad(t, ((0, steps * K - N), (0, 0)))

    kernel = functools.partial(_mse_ssim_kernel, n_planes=N, k_planes=K)

    partials = pl.pallas_call(
        kernel,
        out_shape=jax.ShapeDtypeStruct((steps, 2, P), jnp.float32),
        grid_spec=pltpu.PrefetchScalarGridSpec(
            num_scalar_prefetch=0,
            grid=(steps,),
            in_specs=[
                pl.BlockSpec((K, P), lambda n: (n, 0)),
                pl.BlockSpec((K, P), lambda n: (n, 0)),
                pl.BlockSpec((P, P), lambda n: (0, 0)),   # small, resident
            ],
            out_specs=pl.BlockSpec((1, 2, P), lambda n: (n, 0, 0)),
        ),
        compiler_params=pltpu.CompilerParams(
            dimension_semantics=("parallel",)),
    )(p, t, M)

    count = jnp.float32(N * H * W)
    mse_mean = jnp.sum(partials[:, 0, :]) / count
    ssim_mean = jnp.sum(partials[:, 1, :]) / count
    return loss_weight * mse_mean + (1.0 - ssim_mean)


def reference_loss(pred, target, loss_weight=100.0, window_size=11, sigma=1.5):
    """Pure-JAX reference matching the PyTorch forward semantics."""
    B, C, H, W = pred.shape
    pad = window_size // 2
    g = gaussian_1d(window_size, sigma)
    win2d = jnp.outer(g, g)
    window = jnp.broadcast_to(win2d, (C, 1, window_size, window_size))

    def conv(x):
        return lax.conv_general_dilated(
            x, window, window_strides=(1, 1),
            padding=[(pad, pad), (pad, pad)],
            dimension_numbers=("NCHW", "OIHW", "NCHW"),
            feature_group_count=C)

    mu1 = conv(pred)
    mu2 = conv(target)
    mu1_sq, mu2_sq, mu1_mu2 = mu1 * mu1, mu2 * mu2, mu1 * mu2
    s1 = conv(pred * pred) - mu1_sq
    s2 = conv(target * target) - mu2_sq
    s12 = conv(pred * target) - mu1_mu2
    ssim_map = ((2 * mu1_mu2 + C1) * (2 * s12 + C2)) / (
        (mu1_sq + mu2_sq + C1) * (s1 + s2 + C2))
    mse = jnp.mean((pred - target) ** 2)
    return loss_weight * mse + (1.0 - jnp.mean(ssim_map))


if __name__ == "__main__":
    key = jax.random.PRNGKey(0)
    k1, k2, k3, k4 = jax.random.split(key, 4)

    # Primary case: NCHW input consistent with the PyTorch module.
    pred = jax.random.normal(k1, (2, 4, 16, 16), dtype=jnp.float32)
    target = jax.random.normal(k2, (2, 4, 16, 16), dtype=jnp.float32)
    out = mse_and_ssim_loss(pred, target)
    jax.block_until_ready(out)
    ref = reference_loss(pred, target)
    assert jnp.allclose(out, ref, rtol=1e-4, atol=1e-4), (out, ref)

    # Padded-plane masking: N = 20 planes packed into one 24-plane step.
    pred2 = jax.random.normal(k3, (5, 4, 16, 16), dtype=jnp.float32)
    target2 = jax.random.normal(k4, (5, 4, 16, 16), dtype=jnp.float32)
    out2 = mse_and_ssim_loss(pred2, target2)
    jax.block_until_ready(out2)
    ref2 = reference_loss(pred2, target2)
    assert jnp.allclose(out2, ref2, rtol=1e-4, atol=1e-4), (out2, ref2)

    # Multi-step grid + padded final step (K forced to 8 -> 3 steps,
    # last step has 4 valid planes out of 8).
    out3 = mse_and_ssim_loss(pred2, target2, max_planes_per_step=8)
    jax.block_until_ready(out3)
    assert jnp.allclose(out3, ref2, rtol=1e-4, atol=1e-4), (out3, ref2)

    print("KERNEL_OK")
</pallas_src>

<mosaic_0001>
module attributes {stable_mosaic.version = 11 : i64} {
  func.func @_mse_ssim_kernel(%arg0: i32, %arg1: memref<8x256xf32, #tpu.memory_space<vmem>>, %arg2: memref<8x256xf32, #tpu.memory_space<vmem>>, %arg3: memref<256x256xbf16, #tpu.memory_space<vmem>>, %arg4: memref<1x2x256xf32, #tpu.memory_space<vmem>>) attributes {dimension_semantics = [#tpu.dimension_semantics<parallel>], iteration_bounds = array<i64: 1>, scalar_prefetch = 0 : i64, scratch_operands = 0 : i64, tpu.core_type = #tpu.core_type<tc>, window_params = [{transform_indices = @transform_0, window_bounds = array<i64: 8, 256>}, {transform_indices = @transform_1, window_bounds = array<i64: 8, 256>}, {pipeline_mode = #tpu.pipeline_mode<synchronous>, transform_indices = @transform_2, window_bounds = array<i64: 256, 256>}, {transform_indices = @transform_3, window_bounds = array<i64: 1, 2, 256>}]} {
    %c0 = arith.constant 0 : index
    %c0_0 = arith.constant 0 : index
    %0 = vector.load %arg1[%c0, %c0_0] : memref<8x256xf32, #tpu.memory_space<vmem>>, vector<8x256xf32>
    %c0_1 = arith.constant 0 : index
    %c0_2 = arith.constant 0 : index
    %1 = vector.load %arg2[%c0_1, %c0_2] : memref<8x256xf32, #tpu.memory_space<vmem>>, vector<8x256xf32>
    %c0_3 = arith.constant 0 : index
    %c0_4 = arith.constant 0 : index
    %2 = vector.load %arg3[%c0_3, %c0_4] : memref<256x256xbf16, #tpu.memory_space<vmem>>, vector<256x256xbf16>
    %3 = arith.subf %0, %1 : vector<8x256xf32>
    %4 = arith.mulf %0, %0 : vector<8x256xf32>
    %5 = arith.mulf %1, %1 : vector<8x256xf32>
    %6 = arith.mulf %0, %1 : vector<8x256xf32>
    %7 = tpu.concatenate %0, %1, %4, %5, %6 in 0 : vector<8x256xf32>, vector<8x256xf32>, vector<8x256xf32>, vector<8x256xf32>, vector<8x256xf32> -> vector<40x256xf32>
    %8 = arith.truncf %7 : vector<40x256xf32> to vector<40x256xbf16>
    %cst = arith.constant dense<0.000000e+00> : vector<40x256xf32>
    %9 = tpu.matmul %8, %2, %cst {dimension_numbers = #tpu.dot_dimension_numbers<[1], [0], [0], [1], [0, 0, 1, 1], [], []>} : vector<40x256xbf16>, vector<256x256xbf16>, vector<40x256xf32> -> vector<40x256xf32>
    %10 = vector.extract_strided_slice %9 {offsets = [0, 0], sizes = [8, 256], strides = [1, 1]} : vector<40x256xf32> to vector<8x256xf32>
    %11 = vector.extract_strided_slice %9 {offsets = [8, 0], sizes = [8, 256], strides = [1, 1]} : vector<40x256xf32> to vector<8x256xf32>
    %12 = vector.extract_strided_slice %9 {offsets = [16, 0], sizes = [8, 256], strides = [1, 1]} : vector<40x256xf32> to vector<8x256xf32>
    %13 = vector.extract_strided_slice %9 {offsets = [24, 0], sizes = [8, 256], strides = [1, 1]} : vector<40x256xf32> to vector<8x256xf32>
    %14 = vector.extract_strided_slice %9 {offsets = [32, 0], sizes = [8, 256], strides = [1, 1]} : vector<40x256xf32> to vector<8x256xf32>
    %15 = arith.mulf %10, %10 : vector<8x256xf32>
    %16 = arith.mulf %11, %11 : vector<8x256xf32>
    %17 = arith.mulf %10, %11 : vector<8x256xf32>
    %18 = arith.subf %12, %15 : vector<8x256xf32>
    %19 = arith.subf %13, %16 : vector<8x256xf32>
    %20 = arith.subf %14, %17 : vector<8x256xf32>
    %cst_5 = arith.constant 2.000000e+00 : f32
    %21 = vector.broadcast %cst_5 : f32 to vector<8x256xf32>
    %22 = arith.mulf %21, %17 : vector<8x256xf32>
    %cst_6 = arith.constant 9.99999974E-5 : f32
    %23 = vector.broadcast %cst_6 : f32 to vector<8x256xf32>
    %24 = arith.addf %22, %23 : vector<8x256xf32>
    %cst_7 = arith.constant 2.000000e+00 : f32
    %25 = vector.broadcast %cst_7 : f32 to vector<8x256xf32>
    %26 = arith.mulf %25, %20 : vector<8x256xf32>
    %cst_8 = arith.constant 8.99999984E-4 : f32
    %27 = vector.broadcast %cst_8 : f32 to vector<8x256xf32>
    %28 = arith.addf %26, %27 : vector<8x256xf32>
    %29 = arith.mulf %24, %28 : vector<8x256xf32>
    %30 = arith.addf %15, %16 : vector<8x256xf32>
    %cst_9 = arith.constant 9.99999974E-5 : f32
    %31 = vector.broadcast %cst_9 : f32 to vector<8x256xf32>
    %32 = arith.addf %30, %31 : vector<8x256xf32>
    %33 = arith.addf %18, %19 : vector<8x256xf32>
    %cst_10 = arith.constant 8.99999984E-4 : f32
    %34 = vector.broadcast %cst_10 : f32 to vector<8x256xf32>
    %35 = arith.addf %33, %34 : vector<8x256xf32>
    %36 = arith.mulf %32, %35 : vector<8x256xf32>
    %37 = tpu.reciprocal %36 {approx = true} : vector<8x256xf32> -> vector<8x256xf32>
    %38 = arith.mulf %36, %37 : vector<8x256xf32>
    %cst_11 = arith.constant 2.000000e+00 : f32
    %39 = vector.broadcast %cst_11 : f32 to vector<8x256xf32>
    %40 = arith.subf %39, %38 : vector<8x256xf32>
    %41 = arith.mulf %37, %40 : vector<8x256xf32>
    %42 = arith.mulf %29, %41 : vector<8x256xf32>
    %43 = arith.mulf %3, %3 : vector<8x256xf32>
    %cst_12 = arith.constant dense<0.000000e+00> : vector<256xf32>
    %44 = vector.multi_reduction <add>, %43, %cst_12 [0] : vector<8x256xf32> to vector<256xf32>
    %45 = vector.shape_cast %44 : vector<256xf32> to vector<1x256xf32>
    %c0_13 = arith.constant 0 : index
    %c0_14 = arith.constant 0 : index
    %c0_15 = arith.constant 0 : index
    %46 = vector.load %arg4[%c0_13, %c0_14, %c0_15] : memref<1x2x256xf32, #tpu.memory_space<vmem>>, vector<1x1x256xf32>
    %47 = vector.shape_cast %46 : vector<1x1x256xf32> to vector<1x256xf32>
    %48 = vector.shape_cast %45 : vector<1x256xf32> to vector<1x1x256xf32>
    tpu.vector_store %arg4[%c0_13, %c0_14, %c0_15], %48 {strides = array<i32>} : memref<1x2x256xf32, #tpu.memory_space<vmem>>, vector<1x1x256xf32>,
    %cst_16 = arith.constant dense<0.000000e+00> : vector<256xf32>
    %49 = vector.multi_reduction <add>, %42, %cst_16 [0] : vector<8x256xf32> to vector<256xf32>
    %50 = vector.shape_cast %49 : vector<256xf32> to vector<1x256xf32>
    %c0_17 = arith.constant 0 : index
    %c1 = arith.constant 1 : index
    %c0_18 = arith.constant 0 : index
    %51 = vector.load %arg4[%c0_17, %c1, %c0_18] : memref<1x2x256xf32, #tpu.memory_space<vmem>>, vector<1x1x256xf32>
    %52 = vector.shape_cast %51 : vector<1x1x256xf32> to vector<1x256xf32>
    %53 = vector.shape_cast %50 : vector<1x256xf32> to vector<1x1x256xf32>
    tpu.vector_store %arg4[%c0_17, %c1, %c0_18], %53 {strides = array<i32>} : memref<1x2x256xf32, #tpu.memory_space<vmem>>, vector<1x1x256xf32>,
    return
  }
  func.func @transform_0(%arg0: i32) -> (i32, i32) {
    %c0_i32 = arith.constant 0 : i32
    %c0_i32_0 = arith.constant 0 : i32
    return %arg0, %c0_i32 : i32, i32
  }
  func.func @transform_1(%arg0: i32) -> (i32, i32) {
    %c0_i32 = arith.constant 0 : i32
    %c0_i32_0 = arith.constant 0 : i32
    return %arg0, %c0_i32 : i32, i32
  }
  func.func @transform_2(%arg0: i32) -> (i32, i32) {
    %c0_i32 = arith.constant 0 : i32
    %c0_i32_0 = arith.constant 0 : i32
    %c0_i32_1 = arith.constant 0 : i32
    return %c0_i32, %c0_i32_0 : i32, i32
  }
  func.func @transform_3(%arg0: i32) -> (i32, i32, i32) {
    %c0_i32 = arith.constant 0 : i32
    %c0_i32_0 = arith.constant 0 : i32
    %c0_i32_1 = arith.constant 0 : i32
    return %arg0, %c0_i32, %c0_i32_0 : i32, i32, i32
  }
}

</mosaic_0001>

<bundles_post_ra>
// kernel: tpu_custom_call.1
= control target key start
LH: loop header
LB: loop body
LE: loop exit
PB: predicated region body
PF: predicated region fallthrough
CT: control target
= control target key end

     0   :  { %8 = vsyncpa [#allocation3], 0  ;;  %s748_s0 = inlined_call_operand.hbm [shape: f32[8,256], index: 0, kind: input, shape index: {}]   ;;  %s749_s1 = inlined_call_operand.hbm [shape: f32[8,256], index: 1, kind: input, shape index: {}]   ;;  %s750_s2 = inlined_call_operand.hbm [shape: bf16[256,256], index: 2, kind: input, shape index: {}]   ;;  %s751_s3 = inlined_call_operand.hbm [shape: f32[1,2,256], index: 3, kind: output, shape index: {}]  }
   0x1   :  { %9 = vsyncpa [#allocation6], 0 }
   0x2   :  { %10 = vsyncpa [#allocation4], 0  ;;  %s659_s12 = smov [#allocation5]   ;;  %s660_s14 = smov [#allocation2]  }
   0x3   :  { %s27_s13 = sshll.u32 %s659_s12, 4  ;;  %s17_s15 = sshll.u32 %s660_s14, 4  ;;  %s28_s13 = int_to_ptr.vmem [resolvable:$true] %s27_s13  ;;  %s18_s15 = int_to_ptr.vmem [resolvable:$true] %s17_s15 }
   0x4   :  { %s581_s16 = scalar_lea.vmem %s28_s13, 256  ;;  %p586_p1 = scmp.lt.s32.totalorder %s28_s13, %s28_s13 }
   0x5   :  { %p582_p0 = scmp.ne.s32.totalorder %s28_s13, %s581_s16  ;;  %p587_p2 = scmp.lt.s32.totalorder %s581_s16, %s581_s16 }
   0x7   :  { %p588_p3 = por %p587_p2, %p586_p1 }
   0x9   :  { %p589_p4 = pnand %p588_p3, %p582_p0 }
   0xb   :  { %592 = shalt.err (!%p589_p4)
}
   0xc   :  { %30 = dma.hbm_to_vmem [thread:$0]  %s749_s1, 256, %s28_s13, [#allocation6]  }
   0xd   :  { %s601_s19 = scalar_lea.vmem %s18_s15, 256  ;;  %p606_p6 = scmp.lt.s32.totalorder %s18_s15, %s18_s15 }
   0xe   :  { %p602_p5 = scmp.ne.s32.totalorder %s18_s15, %s601_s19  ;;  %p607_p7 = scmp.lt.s32.totalorder %s601_s19, %s601_s19 }
  0x10   :  { %p608_p8 = por %p607_p7, %p606_p6 }
  0x12   :  { %p609_p9 = pnand %p608_p8, %p602_p5 }
  0x14   :  { %612 = shalt.err (!%p609_p9)
}
  0x15   :  { %20 = dma.hbm_to_vmem [thread:$0]  %s748_s0, 256, %s18_s15, [#allocation3]  }
  0x16   :  { %s661_s22 = smov [#allocation7]  }
  0x17   :  { %s36_s23 = sshll.u32 %s661_s22, 4  ;;  %s37_s23 = int_to_ptr.vmem [resolvable:$true] %s36_s23 }
  0x18   :  { %s621_s24 = scalar_lea.vmem %s37_s23, 4096  ;;  %p626_p11 = scmp.lt.s32.totalorder %s37_s23, %s37_s23 }
  0x19   :  { %p622_p10 = scmp.ne.s32.totalorder %s37_s23, %s621_s24  ;;  %p627_p12 = scmp.lt.s32.totalorder %s621_s24, %s621_s24 }
  0x1b   :  { %p628_p13 = por %p627_p12, %p626_p11 }
  0x1d   :  { %p629_p0 = pnand %p628_p13, %p622_p10 }
  0x1f   :  { %632 = shalt.err (!%p629_p0)
}
  0x20   :  { %s662_s1 = smov 128   ;;  %s663_s25 = smov 8  }
  0x21   :  { %42 = dma.hbm_to_vmem [thread:$0]  %s750_s2, 4096, %s37_s23, [#allocation6], %s662_s1, %s662_s1, %s663_s25  }
  0x22   :  { %653 = dma.done.wait [#allocation3], 256  }
  0x23   :  { %654 = vsyncadd [#allocation3], 4294967040 }
  0x24   :  { %655 = dma.done.wait [#allocation6], 4352  }
  0x25   :  { %656 = vsyncadd [#allocation6], 4294962944  ;;  %v521_v0 = vld [vmem:[#allocation7 + $0x74] ss:$8 sps:$4 sm:$0xff]   ;;  %v523_v1 = vld [vmem:[#allocation7 + $0x70] ss:$8 sps:$4 sm:$0xff]  }
  0x26   :  { %262 = vmatprep.subr.bf16.mxu0 %v521_v0  ;;  %482 = vmatprep.subr.bf16.mxu1 %v521_v0  ;;  %v524_v2 = vld [vmem:[#allocation7 + $0x64] ss:$8 sps:$4 sm:$0xff]   ;;  %v526_v3 = vld [vmem:[#allocation7 + $0x60] ss:$8 sps:$4 sm:$0xff]   ;;  %v527_v4 = vld [vmem:[#allocation7 + $0x54] ss:$8 sps:$4 sm:$0xff]   ;;  %v385_v0 = vlaneseq }
  0x27   :  { %263 = vmatpush1.bf16.msra.mxu0 %v523_v1  ;;  %498 = vmatpush1.bf16.msra.mxu1 %v523_v1  ;;  %v529_v5 = vld [vmem:[#allocation7 + $0x50] ss:$8 sps:$4 sm:$0xff]   ;;  %v530_v6 = vld [vmem:[#allocation7 + $0x44] ss:$8 sps:$4 sm:$0xff]   ;;  %v532_v7 = vld [vmem:[#allocation7 + $0x40] ss:$8 sps:$4 sm:$0xff]  }
  0x28   :  { %264 = vmatprep.subr.bf16.mxu0 %v524_v2  ;;  %483 = vmatprep.subr.bf16.mxu1 %v524_v2  ;;  %v533_v8 = vld [vmem:[#allocation7 + $0x34] ss:$8 sps:$4 sm:$0xff]   ;;  %v535_v9 = vld [vmem:[#allocation7 + $0x30] ss:$8 sps:$4 sm:$0xff]   ;;  %v536_v10 = vld [vmem:[#allocation7 + $0x24] ss:$8 sps:$4 sm:$0xff]  }
  0x29   :  { %v538_v11 = vld [vmem:[#allocation7 + $0x20] ss:$8 sps:$4 sm:$0xff]   ;;  %v539_v12 = vld [vmem:[#allocation7 + $0x14] ss:$8 sps:$4 sm:$0xff]   ;;  %v541_v21 = vld [vmem:[#allocation7 + $0x10] ss:$8 sps:$4 sm:$0xff]  }
  0x2a   :  { %v695_v13 = vld [vmem:[#allocation2 + $0x8] sm:$0xff]  ;;  %v697_v14 = vld [vmem:[#allocation5 + $0x8] sm:$0xff]  ;;  %v709_v19 = vld [vmem:[#allocation2] sm:$0xff]  ;;  %v664_v62 = vmov 1966171168   ;;  %vm734_vm0 = vcmp.lt.s32.totalorder %v385_v0, 256 }
  0x2b   :  { %265 = vmatpush1.bf16.msra.mxu0 %v526_v3  ;;  %499 = vmatpush1.bf16.msra.mxu1 %v526_v3  ;;  %v701_v15 = vsub.f32 %v695_v13, %v697_v14  ;;  %v97_v16 = vpack.c.bf16 %v697_v14, %v695_v13  ;;  %v91_v17 = vmul.f32 %v695_v13, %v695_v13  ;;  %v711_v20 = vld [vmem:[#allocation5] sm:$0xff]  ;;  %v542_v23 = vld [vmem:[#allocation7 + $0x4] ss:$8 sps:$4 sm:$0xff]   ;;  %v544_v25 = vld [vmem:[#allocation7] ss:$8 sps:$4 sm:$0xff]   ;;  %v383_v63 = vunpack.c.l.s4 %v664_v62  ;;  %s665_s0 = smov [#allocation8]  }
  0x2c   :  { %266 = vmatprep.subr.bf16.mxu0 %v527_v4  ;;  %484 = vmatprep.subr.bf16.mxu1 %v527_v4  ;;  %v93_v18 = vmul.f32 %v697_v14, %v697_v14  ;;  %v715_v22 = vsub.f32 %v709_v19, %v711_v20  ;;  %v545_v26 = vld [vmem:[#allocation7 + $0xf4] ss:$8 sps:$4 sm:$0xff]   ;;  %v547_v27 = vld [vmem:[#allocation7 + $0xf0] ss:$8 sps:$4 sm:$0xff]   ;;  %v548_v28 = vld [vmem:[#allocation7 + $0xe4] ss:$8 sps:$4 sm:$0xff]   ;;  %v90_v41 = vmul.f32 %v709_v19, %v709_v19 }
  0x2d   :  { %294 = vmatprep.mubr.bf16.mxu0 %v97_v16  ;;  %v550_v29 = vld [vmem:[#allocation7 + $0xe0] ss:$8 sps:$4 sm:$0xff]   ;;  %v551_v30 = vld [vmem:[#allocation7 + $0xd4] ss:$8 sps:$4 sm:$0xff]   ;;  %v553_v31 = vld [vmem:[#allocation7 + $0xd0] ss:$8 sps:$4 sm:$0xff]   ;;  %v92_v42 = vmul.f32 %v711_v20, %v711_v20  ;;  %v95_v44 = vmul.f32 %v697_v14, %v695_v13  ;;  %v96_v45 = vpack.c.bf16 %v711_v20, %v709_v19  ;;  %v94_v48 = vmul.f32 %v711_v20, %v709_v19 }
  0x2e   :  { %v99_v24 = vpack.c.bf16 %v93_v18, %v91_v17  ;;  %v554_v32 = vld [vmem:[#allocation7 + $0xc4] ss:$8 sps:$4 sm:$0xff]   ;;  %v556_v33 = vld [vmem:[#allocation7 + $0xc0] ss:$8 sps:$4 sm:$0xff]   ;;  %v557_v34 = vld [vmem:[#allocation7 + $0xb4] ss:$8 sps:$4 sm:$0xff]   ;;  %v366_v50 = vmul.f32 %v701_v15, %v701_v15  ;;  %v365_v52 = vmul.f32 %v715_v22, %v715_v22  ;;  %v384_v3 = vunpack.c.0.s8 %v383_v63 }
  0x2f   :  { %267 = vmatpush1.bf16.msra.mxu0 %v529_v5  ;;  %500 = vmatpush1.bf16.msra.mxu1 %v529_v5  ;;  %v559_v35 = vld [vmem:[#allocation7 + $0xb0] ss:$8 sps:$4 sm:$0xff]   ;;  %v560_v36 = vld [vmem:[#allocation7 + $0xa4] ss:$8 sps:$4 sm:$0xff]   ;;  %v562_v37 = vld [vmem:[#allocation7 + $0xa0] ss:$8 sps:$4 sm:$0xff]   ;;  %v98_v46 = vpack.c.bf16 %v92_v42, %v90_v41  ;;  %v101_v47 = vpack.c.bf16 %v95_v44, %v95_v44  ;;  %v100_v49 = vpack.c.bf16 %v94_v48, %v94_v48 }
  0x30   :  { %268 = vmatprep.subr.bf16.mxu0 %v530_v6  ;;  %485 = vmatprep.subr.bf16.mxu1 %v530_v6  ;;  %v563_v38 = vld [vmem:[#allocation7 + $0x94] ss:$8 sps:$4 sm:$0xff]   ;;  %v565_v39 = vld [vmem:[#allocation7 + $0x90] ss:$8 sps:$4 sm:$0xff]   ;;  %v566_v40 = vld [vmem:[#allocation7 + $0x84] ss:$8 sps:$4 sm:$0xff]  }
  0x31   :  { %304 = vmatprep.mubr.bf16.mxu1 %v99_v24  ;;  %v568_v43 = vld [vmem:[#allocation7 + $0x80] ss:$8 sps:$4 sm:$0xff]   ;;  %v373_v51 = vrot.slane %v366_v50, 4  ;;  %v367_v54 = vrot.slane %v365_v52, 4  ;;  %v386_v4 = vshrl.u32 %v385_v0, 7  ;;  %s440_s2 = sshll.u32 %s665_s0, 4  ;;  %s441_s2 = int_to_ptr.vmem [resolvable:$true] %s440_s2 }
  0x32   :  { %s633_s28 = scalar_lea.vmem %s441_s2, 64  ;;  %p638_p2 = scmp.lt.s32.totalorder %s441_s2, %s441_s2 }
  0x33   :  { %269 = vmatpush1.bf16.msra.mxu0 %v532_v7  ;;  %501 = vmatpush1.bf16.msra.mxu1 %v532_v7  ;;  %v374_v53 = vadd.f32 %v373_v51, %v366_v50  ;;  %v368_v56 = vadd.f32 %v367_v54, %v365_v52  ;;  %v731_v6 = vsub.s32 %v384_v3, %v386_v4  ;;  %p634_p1 = scmp.ne.s32.totalorder %s441_s2, %s633_s28  ;;  %p639_p3 = scmp.lt.s32.totalorder %s633_s28, %s633_s28 }
  0x34   :  { %270 = vmatprep.subr.bf16.mxu0 %v533_v8  ;;  %486 = vmatprep.subr.bf16.mxu1 %v533_v8 }
  0x35   :  { %v375_v55 = vrot.slane %v374_v53, 2  ;;  %v369_v58 = vrot.slane %v368_v56, 2  ;;  %p640_p4 = por %p639_p3, %p638_p2 }
  0x37   :  { %271 = vmatpush1.bf16.msra.mxu0 %v535_v9  ;;  %502 = vmatpush1.bf16.msra.mxu1 %v535_v9  ;;  %v376_v57 = vadd.f32 %v375_v55, %v374_v53  ;;  %v370_v60 = vadd.f32 %v369_v58, %v368_v56  ;;  %p641_p5 = pnand %p640_p4, %p634_p1 }
  0x38   :  { %272 = vmatprep.subr.bf16.mxu0 %v536_v10  ;;  %487 = vmatprep.subr.bf16.mxu1 %v536_v10 }
  0x39   :  { %v377_v59 = vrot.slane %v376_v57, 1  ;;  %v371_v61 = vrot.slane %v370_v60, 1 }
  0x3b   :  { %273 = vmatpush1.bf16.msra.mxu0 %v538_v11  ;;  %503 = vmatpush1.bf16.msra.mxu1 %v538_v11  ;;  %v372_v1 = vadd.f32 %v371_v61, %v370_v60  ;;  %v378_v2 = vadd.f32 %v377_v59, %v376_v57 }
  0x3c   :  { %274 = vmatprep.subr.bf16.mxu0 %v539_v12  ;;  %488 = vmatprep.subr.bf16.mxu1 %v539_v12 }
  0x3d   :  { %v381_v5 = vcombine.low %v372_v1, %v378_v2 }
  0x3f   :  { %275 = vmatpush1.bf16.msra.mxu0 %v541_v21  ;;  %504 = vmatpush1.bf16.msra.mxu1 %v541_v21  ;;  %v388_v7 = vrot.slane %v381_v5, %v731_v6 }
  0x40   :  { %276 = vmatprep.subr.bf16.mxu0 %v542_v23  ;;  %489 = vmatprep.subr.bf16.mxu1 %v542_v23 }
  0x41   :  { %v395_v9 = vrot.slane %v388_v7, %v731_v6 }
  0x43   :  { %277 = vmatpush1.bf16.msra.mxu0 %v544_v25  ;;  %505 = vmatpush1.bf16.msra.mxu1 %v544_v25  ;;  %401 = vst.msk [vmem:[#allocation8] ss:$2 sm:$0x3] %vm734_vm0, %v395_v9 }
  0x44   :  { %278 = vmatprep.subr.bf16.mxu0 %v545_v26  ;;  %490 = vmatprep.subr.bf16.mxu1 %v545_v26 }
  0x47   :  { %279 = vmatpush2.bf16.msra.mxu0 %v547_v27  ;;  %506 = vmatpush2.bf16.msra.mxu1 %v547_v27 }
  0x48   :  { %280 = vmatprep.subr.bf16.mxu0 %v548_v28  ;;  %491 = vmatprep.subr.bf16.mxu1 %v548_v28 }
  0x4b   :  { %281 = vmatpush2.bf16.msra.mxu0 %v550_v29  ;;  %507 = vmatpush2.bf16.msra.mxu1 %v550_v29 }
  0x4c   :  { %282 = vmatprep.subr.bf16.mxu0 %v551_v30  ;;  %492 = vmatprep.subr.bf16.mxu1 %v551_v30 }
  0x4f   :  { %283 = vmatpush2.bf16.msra.mxu0 %v553_v31  ;;  %508 = vmatpush2.bf16.msra.mxu1 %v553_v31 }
  0x50   :  { %284 = vmatprep.subr.bf16.mxu0 %v554_v32  ;;  %493 = vmatprep.subr.bf16.mxu1 %v554_v32 }
  0x53   :  { %285 = vmatpush2.bf16.msra.mxu0 %v556_v33  ;;  %509 = vmatpush2.bf16.msra.mxu1 %v556_v33 }
  0x54   :  { %286 = vmatprep.subr.bf16.mxu0 %v557_v34  ;;  %494 = vmatprep.subr.bf16.mxu1 %v557_v34 }
  0x57   :  { %287 = vmatpush2.bf16.msra.mxu0 %v559_v35  ;;  %510 = vmatpush2.bf16.msra.mxu1 %v559_v35 }
  0x58   :  { %288 = vmatprep.subr.bf16.mxu0 %v560_v36  ;;  %495 = vmatprep.subr.bf16.mxu1 %v560_v36 }
  0x5b   :  { %289 = vmatpush2.bf16.msra.mxu0 %v562_v37  ;;  %511 = vmatpush2.bf16.msra.mxu1 %v562_v37 }
  0x5c   :  { %290 = vmatprep.subr.bf16.mxu0 %v563_v38  ;;  %496 = vmatprep.subr.bf16.mxu1 %v563_v38 }
  0x5f   :  { %291 = vmatpush2.bf16.msra.mxu0 %v565_v39  ;;  %512 = vmatpush2.bf16.msra.mxu1 %v565_v39 }
  0x60   :  { %292 = vmatprep.subr.bf16.mxu0 %v566_v40  ;;  %497 = vmatprep.subr.bf16.mxu1 %v566_v40 }
  0x63   :  { %293 = vmatpush2.bf16.msra.mxu0 %v568_v43  ;;  %513 = vmatpush2.bf16.msra.mxu1 %v568_v43 }
  0x66   :  { %295 = vmatmul.mubr.bf16.vlgmr.msra.gmra.mxu0 %v96_v45  ;;  %305 = vmatmul.mubr.bf16.vlgmr.msra.gmra.mxu1 %v98_v46 }
  0x67   :  { %314 = vmatprep.mubr.bf16.mxu1 %v101_v47 }
  0x6e   :  { %315 = vmatmul.mubr.bf16.gmra.mxu1 %v100_v49 }
 0x126   :  { %v296_v10 = vpop.f32.mrf.mxu0  ;;  %v306_v11 = vpop.f32.mrf.mxu1 }
 0x127   :  { %v323_v14 = vmul.f32 %v296_v10, %v296_v10 }
 0x128   :  { %v298_v12 = vpop.f32.mrf.mxu0  ;;  %v308_v13 = vpop.f32.mrf.mxu1 }
 0x129   :  { %v324_v18 = vmul.f32 %v298_v12, %v298_v12  ;;  %v329_v21 = vsub.f32 %v306_v11, %v323_v14 }
 0x12a   :  { %v300_v15 = vpop.f32.mrf.mxu0  ;;  %v310_v16 = vpop.f32.mrf.mxu1 }
 0x12b   :  { %v325_v17 = vmul.f32 %v300_v15, %v300_v15  ;;  %v330_v27 = vsub.f32 %v308_v13, %v324_v18  ;;  %v327_v40 = vmul.f32 %v300_v15, %v296_v10 }
 0x12c   :  { %v302_v19 = vpop.f32.mrf.mxu0  ;;  %v312_v20 = vpop.f32.mrf.mxu1 }
 0x12d   :  { %v345_v22 = vadd.f32 %v325_v17, %v323_v14  ;;  %v331_v23 = vsub.f32 %v310_v16, %v325_v17  ;;  %v326_v24 = vmul.f32 %v302_v19, %v302_v19  ;;  %v328_v42 = vmul.f32 %v302_v19, %v298_v12 }
 0x12e   :  { %v316_v25 = vpop.f32.mrf.mxu1  ;;  %v335_v45 = vmul.f32 2.0, %v327_v40 }
 0x12f   :  { %v349_v26 = vadd.f32 %v331_v23, %v329_v21  ;;  %v346_v28 = vadd.f32 %v326_v24, %v324_v18  ;;  %v332_v29 = vsub.f32 %v312_v20, %v326_v24  ;;  %v347_v31 = vadd.f32 0.0001, %v345_v22 }
 0x130   :  { %v318_v30 = vpop.f32.mrf.mxu1  ;;  %v333_v41 = vsub.f32 %v316_v25, %v327_v40  ;;  %v336_v50 = vmul.f32 2.0, %v328_v42  ;;  %v337_v52 = vadd.f32 0.0001, %v335_v45 }
 0x131   :  { %v351_v32 = vadd.f32 0.0009, %v349_v26  ;;  %v350_v33 = vadd.f32 %v332_v29, %v330_v27  ;;  %v348_v36 = vadd.f32 0.0001, %v346_v28  ;;  %v334_v43 = vsub.f32 %v318_v30, %v328_v42 }
 0x132   :  { %v320_v34 = vpop.f32.mrf.mxu1  ;;  %v339_v44 = vmul.f32 2.0, %v333_v41  ;;  %v338_v58 = vadd.f32 0.0001, %v336_v50 }
 0x133   :  { %v353_v35 = vmul.f32 %v351_v32, %v347_v31  ;;  %v352_v37 = vadd.f32 0.0009, %v350_v33  ;;  %v340_v47 = vmul.f32 2.0, %v334_v43 }
 0x134   :  { %v321_v38 = vpop.f32.mrf.mxu1  ;;  %v341_v49 = vadd.f32 0.0009, %v339_v44 }
 0x135   :  { %569 = vrcp.f32 %v353_v35  ;;  %v354_v39 = vmul.f32 %v352_v37, %v348_v36  ;;  %v342_v55 = vadd.f32 0.0009, %v340_v47 }
 0x136   :  { %v343_v56 = vmul.f32 %v341_v49, %v337_v52 }
 0x137   :  { %571 = vrcp.f32 %v354_v39  ;;  %v344_v61 = vmul.f32 %v342_v55, %v338_v58 }
 0x142   :  { %v570_v46 = vpop.eup %569 }
 0x143   :  { %v357_v48 = vmul.f32 %v570_v46, %v353_v35 }
 0x144   :  { %v572_v51 = vpop.eup %571 }
 0x145   :  { %v359_v53 = vsub.f32 2.0, %v357_v48  ;;  %v358_v54 = vmul.f32 %v572_v51, %v354_v39 }
 0x147   :  { %v361_v57 = vmul.f32 %v570_v46, %v359_v53  ;;  %v360_v59 = vsub.f32 2.0, %v358_v54 }
 0x149   :  { %v363_v60 = vmul.f32 %v361_v57, %v343_v56  ;;  %v362_v62 = vmul.f32 %v572_v51, %v360_v59 }
 0x14b   :  { %v402_v63 = vrot.slane %v363_v60, 4  ;;  %v364_v0 = vmul.f32 %v362_v62, %v344_v61 }
 0x14d   :  { %v403_v1 = vadd.f32 %v402_v63, %v363_v60  ;;  %v408_v2 = vrot.slane %v364_v0, 4 }
 0x14f   :  { %v404_v3 = vrot.slane %v403_v1, 2  ;;  %v409_v4 = vadd.f32 %v408_v2, %v364_v0 }
 0x151   :  { %v405_v5 = vadd.f32 %v404_v3, %v403_v1  ;;  %v410_v7 = vrot.slane %v409_v4, 2 }
 0x153   :  { %v406_v9 = vrot.slane %v405_v5, 1  ;;  %v411_v10 = vadd.f32 %v410_v7, %v409_v4 }
 0x155   :  { %v412_v11 = vrot.slane %v411_v10, 1  ;;  %v407_v12 = vadd.f32 %v406_v9, %v405_v5 }
 0x157   :  { %v413_v13 = vadd.f32 %v412_v11, %v411_v10 }
 0x159   :  { %v416_v14 = vcombine.low %v407_v12, %v413_v13 }
 0x15b   :  { %v423_v15 = vrot.slane %v416_v14, %v731_v6 }
 0x15d   :  { %v430_v16 = vrot.slane %v423_v15, %v731_v6 }
 0x15f   :  { %433 = vst.msk [vmem:[#allocation8 + $0x1] ss:$2 sm:$0x3] %vm734_vm0, %v430_v16 }
 0x160   :  { %644 = shalt.err (!%p641_p5)
}
 0x161   :  { %443 = dma.vmem_to_hbm [thread:$0]  %s441_s2, 64, %s751_s3, [#allocation4]  }
 0x162   :  { %657 = dma.done.wait [#allocation4], 64  }
 0x163   :  { %658 = vsyncadd [#allocation4], 4294967232 }
 0x164   :  { %447 = vsyncpa [#allocation3], 1 }
 0x165   :  { %448 = vsyncpa [#allocation6], 1 }
 0x166   :  { %449 = vsyncpa [#allocation4], 1 }

</bundles_post_ra>
